<compile_context>
chip_gen: v7x
topology: tpu7x:2x2x1
jax: 0.10.0
libtpu: 0.0.40
codegen_flags: <defaults>
</compile_context>

<pallas_src>
import functools

import numpy as np
import jax
import jax.numpy as jnp
from jax.experimental import pallas as pl
from jax.experimental.pallas import tpu as pltpu


def _round_up(x, m):
    return ((x + m - 1) // m) * m


def _cdiv(a, b):
    return -(-a // b)


def _padded_feature_dim(d):
    """Smallest divisor of 128 that is >= d (or multiple of 128 for d > 128)."""
    if d <= 128:
        for cand in (8, 16, 32, 64, 128):
            if cand >= d:
                return cand
    return _round_up(d, 128)


def _time_encode_kernel(ts_ref, const_ref, out_ref, *, pack):
    # ts_ref:    (TILE_R, pack)        compact timestamps, `pack` per row
    # const_ref: (1 + pack, PD)        row 0 = tiled phase,
    #                                  rows 1..pack = masked tiled freq rows
    # out_ref:   (TILE_R, PD)          lane-dense output block
    tile_r, pd = out_ref.shape
    ts = ts_ref[...]                                     # (TILE_R, pack)

    # arg[r, j] = phase[j % D_pad] + ts[r, j // D_pad] * freq[j % D_pad]
    # Each fmask row is non-zero on exactly one lane-group, so the sum below is
    # exact (only zeros are added besides the single real product).
    t0 = jnp.broadcast_to(ts[:, 0:1], (tile_r, pd))
    arg = t0 * const_ref[1:2, :] + const_ref[0:1, :]
    for p in range(1, pack):
        tp = jnp.broadcast_to(ts[:, p:p + 1], (tile_r, pd))
        arg = arg + tp * const_ref[1 + p:2 + p, :]

    out_ref[...] = jnp.cos(arg).astype(out_ref.dtype)


def time_encode(ts, basis_freq, phase, *, tile_rows=4096, out_dtype=jnp.float32):
    """ts: (B, L) float32 -> (B, L, D) (TGAT TimeEncode forward)."""
    B, L = ts.shape
    D = basis_freq.shape[0]
    N = B * L
    f32 = jnp.float32

    # Pad D to a divisor of 128 so PD = pack * D_pad is a multiple of 128
    # (lane-dense stores for any D); pack consecutive timesteps per row.
    D_pad = _padded_feature_dim(D)
    pack = 128 // D_pad if D_pad <= 128 else 1
    PD = pack * D_pad

    # Packed-row count, padded only to the 8-sublane minimum (no tile-multiple
    # padding: the grid uses a ragged last block instead, so the post-kernel
    # [:N] slice is skipped whenever 8*pack divides N).
    R = _cdiv(max(N, 1), pack)
    R8 = _round_up(R, 8)
    N_pad = R8 * pack

    ts_flat = ts.reshape(N).astype(f32)
    if N_pad != N:
        ts_flat = jnp.pad(ts_flat, (0, N_pad - N))
    ts_packed = ts_flat.reshape(R8, pack)

    # Constant block: row 0 = tiled phase; rows 1..pack = masked tiled freq.
    freq_p = jnp.zeros((D_pad,), f32).at[:D].set(basis_freq.astype(f32))
    phase_p = jnp.zeros((D_pad,), f32).at[:D].set(phase.astype(f32))
    phase_t = jnp.tile(phase_p, pack)[None, :]                      # (1, PD)
    freq_t = jnp.tile(freq_p, pack)[None, :]                        # (1, PD)
    group = jnp.arange(PD, dtype=jnp.int32) // D_pad                # (PD,)
    onehot = (group[None, :] ==
              jnp.arange(pack, dtype=jnp.int32)[:, None]).astype(f32)
    fmask = onehot * freq_t                                         # (pack, PD)
    consts = jnp.concatenate([phase_t, fmask], axis=0)              # (1+pack, PD)

    # Tile height: as large as the VMEM budget allows (output block tile_r*PD*4
    # bytes + the lane-padded ts block of the same size, double-buffered), but
    # split into >= 2 grid steps when possible so v7x can use both TensorCores.
    half = _round_up(_cdiv(R8, 2), 8)
    tile_r = max(8, min(tile_rows, half))
    num_steps = _cdiv(R8, tile_r)

    kernel = functools.partial(_time_encode_kernel, pack=pack)

    out = pl.pallas_call(
        kernel,
        out_shape=jax.ShapeDtypeStruct((R8, PD), out_dtype),
        grid=(num_steps,),
        in_specs=[
            pl.BlockSpec((tile_r, pack), lambda i: (i, 0)),      # compact ts
            pl.BlockSpec((1 + pack, PD), lambda i: (0, 0)),      # phase + fmask
        ],
        out_specs=pl.BlockSpec((tile_r, PD), lambda i: (i, 0)),
        compiler_params=pltpu.CompilerParams(
            # Independent row tiles: lets v7x shard grid steps across its 2 TCs;
            # harmless on single-TC v5e/v6e.
            dimension_semantics=("parallel",),
            # Headroom above v5e's 16 MiB scoped default; well within v7x's
            # 64 MiB physical.  Usage at tile_rows=4096 is ~8.3 MiB.
            vmem_limit_bytes=32 * 1024 * 1024,
        ),
    )(ts_packed, consts)

    # (R8, pack*D_pad) -> (N_pad, D_pad) is a free row-major reshape; the
    # slices below only materialize when D or N actually needed padding.
    out = out.reshape(N_pad, D_pad)
    if D_pad != D:
        out = out[:, :D]
    if N_pad != N:
        out = out[:N]
    return out.reshape(B, L, D)


if __name__ == "__main__":
    # Module config (mirrors TimeEncode.__init__)
    expand_dim = 32  # time_dim / D

    # Deterministic parameter init, exactly as in the PyTorch module:
    basis_freq = jnp.asarray(
        1.0 / 10 ** np.linspace(0, 9, expand_dim), dtype=jnp.float32
    )
    phase = jnp.zeros((expand_dim,), dtype=jnp.float32)

    key = jax.random.PRNGKey(0)
    k1, k2 = jax.random.split(key)

    # Test 1: small (batch=2, seq_len=8) — single grid step, no padding slice.
    ts1 = jax.random.uniform(k1, (2, 8), dtype=jnp.float32,
                             minval=0.0, maxval=100.0)
    out1 = jax.block_until_ready(time_encode(ts1, basis_freq, phase))
    ref1 = jnp.cos(ts1[:, :, None] * basis_freq[None, None, :]
                   + phase[None, None, :])
    assert out1.shape == (2, 8, expand_dim)
    np.testing.assert_allclose(np.asarray(out1), np.asarray(ref1),
                               rtol=1e-5, atol=1e-5)

    # Test 2: (batch=3, seq_len=30) — exercises the multi-step grid, the ragged
    # last block and the padding/slice path (N = 90 is not a multiple of 32).
    ts2 = jax.random.uniform(k2, (3, 30), dtype=jnp.float32,
                             minval=0.0, maxval=100.0)
    out2 = jax.block_until_ready(time_encode(ts2, basis_freq, phase))
    ref2 = jnp.cos(ts2[:, :, None] * basis_freq[None, None, :]
                   + phase[None, None, :])
    assert out2.shape == (3, 30, expand_dim)
    np.testing.assert_allclose(np.asarray(out2), np.asarray(ref2),
                               rtol=1e-5, atol=1e-5)

    print("KERNEL_OK")
</pallas_src>

<mosaic_0001>
module attributes {stable_mosaic.version = 11 : i64} {
  func.func @_time_encode_kernel(%arg0: i32, %arg1: memref<8x4xf32, #tpu.memory_space<vmem>>, %arg2: memref<5x128xf32, #tpu.memory_space<vmem>>, %arg3: memref<8x128xf32, #tpu.memory_space<vmem>>) attributes {dimension_semantics = [#tpu.dimension_semantics<parallel>], iteration_bounds = array<i64: 1>, scalar_prefetch = 0 : i64, scratch_operands = 0 : i64, tpu.core_type = #tpu.core_type<tc>, window_params = [{transform_indices = @transform_0, window_bounds = array<i64: 8, 4>}, {pipeline_mode = #tpu.pipeline_mode<synchronous>, transform_indices = @transform_1, window_bounds = array<i64: 5, 128>}, {transform_indices = @transform_2, window_bounds = array<i64: 8, 128>}]} {
    %c0 = arith.constant 0 : index
    %c0_0 = arith.constant 0 : index
    %0 = vector.load %arg1[%c0, %c0_0] : memref<8x4xf32, #tpu.memory_space<vmem>>, vector<8x4xf32>
    %1 = vector.extract_strided_slice %0 {offsets = [0, 0], sizes = [8, 1], strides = [1, 1]} : vector<8x4xf32> to vector<8x1xf32>
    %2 = vector.shape_cast %1 : vector<8x1xf32> to vector<8x1xf32>
    %3 = vector.broadcast %2 : vector<8x1xf32> to vector<8x128xf32>
    %c1 = arith.constant 1 : index
    %c0_1 = arith.constant 0 : index
    %4 = vector.load %arg2[%c1, %c0_1] : memref<5x128xf32, #tpu.memory_space<vmem>>, vector<1x128xf32>
    %5 = vector.broadcast %4 : vector<1x128xf32> to vector<8x128xf32>
    %6 = arith.mulf %3, %5 : vector<8x128xf32>
    %c0_2 = arith.constant 0 : index
    %c0_3 = arith.constant 0 : index
    %7 = vector.load %arg2[%c0_2, %c0_3] : memref<5x128xf32, #tpu.memory_space<vmem>>, vector<1x128xf32>
    %8 = vector.broadcast %7 : vector<1x128xf32> to vector<8x128xf32>
    %9 = arith.addf %6, %8 : vector<8x128xf32>
    %10 = vector.extract_strided_slice %0 {offsets = [0, 1], sizes = [8, 1], strides = [1, 1]} : vector<8x4xf32> to vector<8x1xf32>
    %11 = vector.shape_cast %10 : vector<8x1xf32> to vector<8x1xf32>
    %12 = vector.broadcast %11 : vector<8x1xf32> to vector<8x128xf32>
    %c2 = arith.constant 2 : index
    %c0_4 = arith.constant 0 : index
    %13 = vector.load %arg2[%c2, %c0_4] : memref<5x128xf32, #tpu.memory_space<vmem>>, vector<1x128xf32>
    %14 = vector.broadcast %13 : vector<1x128xf32> to vector<8x128xf32>
    %15 = arith.mulf %12, %14 : vector<8x128xf32>
    %16 = arith.addf %9, %15 : vector<8x128xf32>
    %17 = vector.extract_strided_slice %0 {offsets = [0, 2], sizes = [8, 1], strides = [1, 1]} : vector<8x4xf32> to vector<8x1xf32>
    %18 = vector.shape_cast %17 : vector<8x1xf32> to vector<8x1xf32>
    %19 = vector.broadcast %18 : vector<8x1xf32> to vector<8x128xf32>
    %c3 = arith.constant 3 : index
    %c0_5 = arith.constant 0 : index
    %20 = vector.load %arg2[%c3, %c0_5] : memref<5x128xf32, #tpu.memory_space<vmem>>, vector<1x128xf32>
    %21 = vector.broadcast %20 : vector<1x128xf32> to vector<8x128xf32>
    %22 = arith.mulf %19, %21 : vector<8x128xf32>
    %23 = arith.addf %16, %22 : vector<8x128xf32>
    %24 = vector.extract_strided_slice %0 {offsets = [0, 3], sizes = [8, 1], strides = [1, 1]} : vector<8x4xf32> to vector<8x1xf32>
    %25 = vector.shape_cast %24 : vector<8x1xf32> to vector<8x1xf32>
    %26 = vector.broadcast %25 : vector<8x1xf32> to vector<8x128xf32>
    %c4 = arith.constant 4 : index
    %c0_6 = arith.constant 0 : index
    %27 = vector.load %arg2[%c4, %c0_6] : memref<5x128xf32, #tpu.memory_space<vmem>>, vector<1x128xf32>
    %28 = vector.broadcast %27 : vector<1x128xf32> to vector<8x128xf32>
    %29 = arith.mulf %26, %28 : vector<8x128xf32>
    %30 = arith.addf %23, %29 : vector<8x128xf32>
    %31 = math.cos %30 : vector<8x128xf32>
    %c0_7 = arith.constant 0 : index
    %c0_8 = arith.constant 0 : index
    %32 = vector.load %arg3[%c0_7, %c0_8] : memref<8x128xf32, #tpu.memory_space<vmem>>, vector<8x128xf32>
    tpu.vector_store %arg3[%c0_7, %c0_8], %31 {strides = array<i32>} : memref<8x128xf32, #tpu.memory_space<vmem>>, vector<8x128xf32>,
    return
  }
  func.func @transform_0(%arg0: i32) -> (i32, i32) {
    %c0_i32 = arith.constant 0 : i32
    %c0_i32_0 = arith.constant 0 : i32
    return %arg0, %c0_i32 : i32, i32
  }
  func.func @transform_1(%arg0: i32) -> (i32, i32) {
    %c0_i32 = arith.constant 0 : i32
    %c0_i32_0 = arith.constant 0 : i32
    %c0_i32_1 = arith.constant 0 : i32
    return %c0_i32, %c0_i32_0 : i32, i32
  }
  func.func @transform_2(%arg0: i32) -> (i32, i32) {
    %c0_i32 = arith.constant 0 : i32
    %c0_i32_0 = arith.constant 0 : i32
    return %arg0, %c0_i32 : i32, i32
  }
}

</mosaic_0001>

<bundles_post_ra>
// kernel: tpu_custom_call.1
= control target key start
LH: loop header
LB: loop body
LE: loop exit
PB: predicated region body
PF: predicated region fallthrough
CT: control target
= control target key end

     0   :  { %v238_v1 = vmov 0   ;;  %v239_v2 = vmov 2   ;;  %s315_s0 = inlined_call_operand.vmem [shape: f32[8,4], index: 0, kind: input, shape index: {}]   ;;  %s316_s1 = inlined_call_operand.vmem [shape: f32[5,128], index: 1, kind: input, shape index: {}]   ;;  %s317_s2 = inlined_call_operand.hbm [shape: f32[8,128], index: 2, kind: output, shape index: {}]  }
   0x1   :  { %v12_v0 = vld [vmem:[%s315_s0] sm:$0xff]  ;;  %205 = vset.pattern.permute.xlu0 %v238_v1  ;;  %207 = vset.pattern.permute.xlu1 %v239_v2 }
   0x2   :  { %7 = vsyncpa [#allocation3], 0  ;;  %15 = vperm.xlu0 %205, %v12_v0   ;;  %42 = vperm.xlu1 %207, %v12_v0   ;;  %v240_v3 = vmov 1   ;;  %v241_v4 = vmov 3   ;;  %v181_v5 = vld [vmem:[%s316_s1 + $0x1] ss:$0 sm:$0xff] }
   0x3   :  { %v182_v9 = vld [vmem:[%s316_s1] ss:$0 sm:$0xff]  ;;  %v183_v10 = vld [vmem:[%s316_s1 + $0x2] ss:$0 sm:$0xff]  ;;  %v184_v11 = vld [vmem:[%s316_s1 + $0x3] ss:$0 sm:$0xff] }
   0x4   :  { %v185_v13 = vld [vmem:[%s316_s1 + $0x4] ss:$0 sm:$0xff]  ;;  %v242_v33 = vmov 2102212464   ;;  %v243_v35 = vmov 920167782  }
   0x5   :  { %v244_v39 = vmov 1326507024   ;;  %v245_v41 = vmov 683565275   ;;  %v246_v43 = vmov 2475754826  }
   0x6   :  { %206 = vset.pattern.permute.xlu0 %v240_v3  ;;  %208 = vset.pattern.permute.xlu1 %v241_v4  ;;  %v247_v46 = vmov 2131351028   ;;  %s248_s1 = smov [#allocation2]  }
   0x7   :  { %31 = vperm.xlu0 %206, %v12_v0   ;;  %53 = vperm.xlu1 %208, %v12_v0   ;;  %s173_s20 = sshll.u32 %s248_s1, 4  ;;  %s174_s20 = int_to_ptr.vmem [resolvable:$true] %s173_s20 }
   0x8   :  { %s214_s21 = scalar_lea.vmem %s174_s20, 128  ;;  %p219_p1 = scmp.lt.s32.totalorder %s174_s20, %s174_s20 }
   0x9   :  { %p215_p0 = scmp.ne.s32.totalorder %s174_s20, %s214_s21  ;;  %p220_p2 = scmp.lt.s32.totalorder %s214_s21, %s214_s21 }
   0xb   :  { %209 = vset.pattern.permute.xlu0 %v241_v4  ;;  %p221_p3 = por %p220_p2, %p219_p1 }
   0xd   :  { %p222_p4 = pnand %p221_p3, %p215_p0 }
  0x81   :  { %v16_v6 = vpop.permute.xlu0 %15  ;;  %v43_v7 = vpop.permute.xlu1 %42 }
  0x82   :  { %v23_v8 = vmul.f32 %v181_v5, %v16_v6  ;;  %v50_v17 = vmul.f32 %v184_v11, %v43_v7 }
  0x84   :  { %v29_v15 = vadd.f32 %v182_v9, %v23_v8 }
  0x86   :  { %v32_v12 = vpop.permute.xlu0 %31  ;;  %v54_v14 = vpop.permute.xlu1 %53 }
  0x87   :  { %v39_v16 = vmul.f32 %v183_v10, %v32_v12  ;;  %v61_v19 = vmul.f32 %v185_v13, %v54_v14 }
  0x89   :  { %v40_v18 = vadd.f32 %v39_v16, %v29_v15 }
  0x8b   :  { %v51_v20 = vadd.f32 %v50_v17, %v40_v18 }
  0x8d   :  { %v282_v21 = vadd.f32 %v61_v19, %v51_v20 }
  0x8f   :  { %v66_v22 = vand.u32 2139095040, %v282_v21  ;;  %v63_v23 = vand.u32 2147483647, %v282_v21  ;;  %vm65_vm7 = vcmp.lt.s32.totalorder %v282_v21, 0  ;;  %vm155_vm12 = vweird.f32 %v282_v21 }
  0x91   :  { %v67_v24 = vshrl.u32 %v66_v22, 23  ;;  %v70_v26 = vand.u32 8388607, %v63_v23  ;;  %vm64_vm8 = vcmp.le.f32.partialorder %v63_v23, 0.7853982 }
  0x93   :  { %v186_v25 = vadd.s32 4294967169, %v67_v24  ;;  %v71_v29 = vor.u32 8388608, %v70_v26 }
  0x95   :  { %v73_v27 = vadd.s32 1, %v186_v25  ;;  %v111_v37 = vshll.u32 %v71_v29, 8 }
  0x97   :  { %vm74_vm0 = vcmp.gt.s32.totalorder %v73_v27, 0 }
  0x98   :  { %v75_v28 = vsel %vm74_vm0, %v73_v27, 0 }
  0x99   :  { %v77_v30 = vand.u32 31, %v75_v28  ;;  %v76_v31 = vshrl.u32 %v75_v28, 5 }
  0x9b   :  { %v78_v32 = vsub.s32 32, %v77_v30  ;;  %v89_v34 = vshll.u32 %v242_v33, %v77_v30  ;;  %v92_v36 = vshll.u32 %v243_v35, %v77_v30  ;;  %v80_v42 = vshll.u32 %v245_v41, %v77_v30 }
  0x9c   :  { %v83_v45 = vshll.u32 %v246_v43, %v77_v30  ;;  %v86_v48 = vshll.u32 %v247_v46, %v77_v30  ;;  %vm98_vm1 = vcmp.lt.s32.totalorder %v76_v31, 4  ;;  %vm95_vm2 = vcmp.lt.s32.totalorder %v76_v31, 1 }
  0x9d   :  { %v90_v38 = vshrl.u32 %v243_v35, %v78_v32  ;;  %v93_v40 = vshrl.u32 %v244_v39, %v78_v32  ;;  %v81_v44 = vshrl.u32 %v246_v43, %v78_v32  ;;  %v84_v47 = vshrl.u32 %v247_v46, %v78_v32 }
  0x9e   :  { %v87_v49 = vshrl.u32 %v242_v33, %v78_v32  ;;  %v79_v53 = vshrl.u32 %v245_v41, %v78_v32  ;;  %vm96_vm3 = vcmp.lt.s32.totalorder %v76_v31, 2  ;;  %vm97_vm4 = vcmp.lt.s32.totalorder %v76_v31, 3 }
  0x9f   :  { %v91_v50 = vor.u32 %v90_v38, %v89_v34  ;;  %v94_v51 = vor.u32 %v93_v40, %v92_v36  ;;  %v82_v52 = vor.u32 %v81_v44, %v80_v42  ;;  %v85_v54 = vor.u32 %v84_v47, %v83_v45 }
  0xa0   :  { %v88_v55 = vor.u32 %v87_v49, %v86_v48 }
  0xa1   :  { %v104_v56 = vsel %vm98_vm1, %v91_v50, 920167782  ;;  %v108_v57 = vsel %vm98_vm1, %v94_v51, 1326507024  ;;  %v103_v59 = vsel %vm95_vm2, %v82_v52, %v85_v54  ;;  %v99_v62 = vsel %vm95_vm2, %v79_v53, %v82_v52 }
  0xa2   :  { %v100_v58 = vsel %vm98_vm1, %v88_v55, 2102212464  ;;  %v105_v60 = vsel %vm97_vm4, %v88_v55, %v104_v56  ;;  %v107_v61 = vsel %vm95_vm2, %v85_v54, %v88_v55  ;;  %v109_v1 = vsel %vm97_vm4, %v91_v50, %v108_v57 }
  0xa3   :  { %v101_v63 = vsel %vm97_vm4, %v85_v54, %v100_v58  ;;  %v106_v0 = vsel %vm96_vm3, %v103_v59, %v105_v60  ;;  %v110_v2 = vsel %vm96_vm3, %v107_v61, %v109_v1 }
  0xa4   :  { %v288_v3 = vmul.u32.u64.low %v111_v37, %v106_v0  ;;  %v289_v4 = vmul.u32.u64.high %v111_v37, %v106_v0, %v288_v3  ;;  %v291_v5 = vmul.u32.u64.low %v111_v37, %v110_v2  ;;  %v292_v6 = vmul.u32.u64.high %v111_v37, %v110_v2, %v291_v5 }
  0xa5   :  { %v102_v7 = vsel %vm96_vm3, %v99_v62, %v101_v63 }
  0xa6   :  { %v121_v8 = vadd.s32 1, %v289_v4  ;;  %v118_v9 = vmul.u32 %v111_v37, %v102_v7  ;;  %vm120_vm5 = vc.u32 %v292_v6, %v288_v3  ;;  %v119_v22 = vadd.s32 %v288_v3, %v292_v6 }
  0xa8   :  { %v122_v10 = vsel %vm120_vm5, %v121_v8, %v289_v4 }
  0xa9   :  { %v123_v11 = vadd.s32 %v122_v10, %v118_v9 }
  0xab   :  { %v124_v12 = vadd.s32 536870912, %v123_v11 }
  0xad   :  { %v125_v13 = vshrl.u32 %v124_v12, 30 }
  0xaf   :  { %v126_v14 = vshll.u32 %v125_v13, 30  ;;  %v149_v37 = vsub.s32 4, %v125_v13 }
  0xb1   :  { %v127_v15 = vsub.s32 %v123_v11, %v126_v14  ;;  %v150_v39 = vsel %vm65_vm7, %v149_v37, %v125_v13 }
  0xb2   :  { %v152_v40 = vsel %vm64_vm8, 0, %v150_v39 }
  0xb3   :  { %v129_v16 = vsub.s32 0, %v127_v15  ;;  %v156_v41 = vand.u32 3, %v152_v40 }
  0xb5   :  { %v187_v17 = vmin.u32 %v129_v16, %v127_v15  ;;  %vm161_vm9 = vcmp.eq.s32.totalorder %v156_v41, 2  ;;  %vm158_vm10 = vcmp.eq.s32.totalorder %v156_v41, 0  ;;  %vm157_vm11 = vcmp.lt.s32.totalorder %v156_v41, 2 }
  0xb7   :  { %v131_v18 = vclz %v187_v17 }
  0xb9   :  { %v188_v19 = vadd.s32 4294967294, %v131_v18 }
  0xbb   :  { %vm189_vm6 = vcmp.lt.s32.totalorder %v188_v19, 0 }
  0xbc   :  { %v134_v20 = vsel %vm189_vm6, 0, %v188_v19 }
  0xbd   :  { %v135_v24 = vsub.s32 32, %v134_v20  ;;  %v139_v25 = vsub.s32 4294967266, %v134_v20  ;;  %v136_v26 = vshll.u32 %v127_v15, %v134_v20 }
  0xbf   :  { %v137_v27 = vshrl.u32 %v119_v22, %v135_v24  ;;  %v140_v28 = vadd.s32 127, %v139_v25 }
  0xc1   :  { %v138_v29 = vor.u32 %v137_v27, %v136_v26  ;;  %v141_v30 = vshll.u32 %v140_v28, 23 }
  0xc3   :  { %v142_v31 = vor.u32 4788187, %v141_v30  ;;  %v145_v33 = vcvt.s32.f32 %v138_v29 }
  0xc5   :  { %v143_v32 = vand.u32 2147483647, %v142_v31 }
  0xc7   :  { %v146_v34 = vmul.f32 %v145_v33, %v143_v32 }
  0xc9   :  { %v147_v35 = vxor.u32 2147483648, %v146_v34 }
  0xcb   :  { %v148_v36 = vsel %vm65_vm7, %v147_v35, %v146_v34 }
  0xcc   :  { %v151_v38 = vsel %vm64_vm8, %v282_v21, %v148_v36 }
  0xcd   :  { %210 = vcosq.f32 %v151_v38 }
  0xce   :  { %212 = vsinq.f32 %v151_v38 }
  0xd7   :  { %v211_v42 = vpop.eup %210 }
  0xd8   :  { %v213_v43 = vpop.eup %212  ;;  %v162_v44 = vxor.u32 2147483648, %v211_v42 }
  0xd9   :  { %v159_v45 = vxor.u32 2147483648, %v213_v43 }
  0xda   :  { %v163_v46 = vsel %vm161_vm9, %v162_v44, %v213_v43 }
  0xdb   :  { %v160_v23 = vsel %vm158_vm10, %v211_v42, %v159_v45 }
  0xdc   :  { %v164_v47 = vsel %vm157_vm11, %v160_v23, %v163_v46 }
  0xdd   :  { %v165_v48 = vsel %vm155_vm12, nan, %v164_v47 }
  0xde   :  { %166 = vst [vmem:[#allocation2] sm:$0xff] %v165_v48 }
  0xdf   :  { %225 = shalt.err (!%p222_p4)
}
  0xe0   :  { %s226_s24 = scalar_lea.hbm %s317_s2, 128 }
  0xe1   :  { %p227_p5 = scmp.ne.s32.totalorder %s317_s2, %s226_s24  ;;  %p230_p6 = scmp.lt.u32.totalorder %s226_s24, %s317_s2 }
  0xe3   :  { %p232_p7 = pnand %p230_p6, %p227_p5 }
  0xe5   :  { %235 = shalt.err (!%p232_p7)
}
  0xe6   :  { %176 = dma.vmem_to_hbm [thread:$0]  %s174_s20, 128, %s317_s2, [#allocation3]  }
  0xe7   :  { %236 = dma.done.wait [#allocation3], 128  }
  0xe8   :  { %237 = vsyncadd [#allocation3], 4294967168 }
  0xe9   :  { %180 = vsyncpa [#allocation3], 1 }

</bundles_post_ra>
